<compile_context>
chip_gen: v7x
topology: tpu7x:2x2x1
jax: 0.10.0
libtpu: 0.0.40
codegen_flags: <defaults>
</compile_context>

<pallas_src>
import jax
import jax.numpy as jnp
from jax import lax
from jax.experimental import pallas as pl
from jax.experimental.pallas import tpu as pltpu


def _round_up(x, m):
    return (x + m - 1) // m * m


def rnn_fc_kernel(emb_ref,      # [1, T*Bt, Ep] bf16 (time-major within batch tile)
                  w_ih_ref,     # [Ep, Hp]      bf16 (W_ih^T, zero-padded)
                  w_hh_ref,     # [Hp, Hp]      f32  (W_hh^T, zero-padded)
                  b_ref,        # [1, Hp]       f32  (b_ih + b_hh, zero-padded)
                  w_fc_ref,     # [Hp, Op]      bf16 (W_fc^T, zero-padded)
                  b_fc_ref,     # [1, Op]       f32  (zero-padded)
                  out_ref,      # [Bt, Op]      f32  (lane-dense logits block)
                  xproj_ref):   # [T*Bt, Hp]    f32  VMEM scratch
    TB = emb_ref.shape[1]
    Bt = out_ref.shape[0]
    Hp = w_hh_ref.shape[0]
    T = TB // Bt

    # (1) One bf16 MXU GEMM for the input projection of every timestep in this
    #     batch tile, f32 accumulation, RNN biases (pre-summed) folded in.
    emb2d = emb_ref[0]                                        # [T*Bt, Ep] bf16
    xproj_ref[...] = (
        jnp.dot(emb2d, w_ih_ref[...], preferred_element_type=jnp.float32)
        + b_ref[...]
    )

    # (2) Recurrence: one f32 matmul + tanh per step, h carried in vregs.
    w_hh = w_hh_ref[...]

    def step(t, h):
        r0 = pl.multiple_of(t * Bt, Bt)
        x_t = xproj_ref[pl.ds(r0, Bt), :]                     # [Bt, Hp]
        return jnp.tanh(
            x_t + jnp.dot(h, w_hh, preferred_element_type=jnp.float32))

    h_T = lax.fori_loop(0, T, step, jnp.zeros((Bt, Hp), jnp.float32),
                        unroll=min(T, 8))

    # (3) fc(out[:, -1, :]) == fc(h_T); bf16 MXU GEMM, lane-dense store.
    out_ref[...] = (
        jnp.dot(h_T.astype(w_fc_ref.dtype), w_fc_ref[...],
                preferred_element_type=jnp.float32)
        + b_fc_ref[...])


def prepare_params(params):
    """One-time packing: pad weights to TPU-native tiles, bf16 the GEMM operands."""
    V, E = params["emb"].shape
    H = params["w_hh"].shape[0]
    O = params["w_fc"].shape[1]
    Ep, Hp, Op = _round_up(E, 128), _round_up(H, 128), _round_up(O, 128)

    emb = (jnp.zeros((V, Ep), jnp.bfloat16)
           .at[:, :E].set(params["emb"].astype(jnp.bfloat16)))
    w_ih = (jnp.zeros((Ep, Hp), jnp.bfloat16)
            .at[:E, :H].set(params["w_ih"].astype(jnp.bfloat16)))
    w_hh = jnp.zeros((Hp, Hp), jnp.float32).at[:H, :H].set(params["w_hh"])
    b = jnp.zeros((1, Hp), jnp.float32).at[0, :H].set(
        params["b_ih"] + params["b_hh"])
    w_fc = (jnp.zeros((Hp, Op), jnp.bfloat16)
            .at[:H, :O].set(params["w_fc"].astype(jnp.bfloat16)))
    b_fc = jnp.zeros((1, Op), jnp.float32).at[0, :O].set(params["b_fc"])
    # NOTE: zero padding is load-bearing — padded hidden lanes stay exactly 0
    # through tanh, and padded W_fc rows keep them out of the logits.
    return dict(emb=emb, w_ih=w_ih, w_hh=w_hh, b=b, w_fc=w_fc, b_fc=b_fc,
                dims=(E, H, O))


def rnn_forward(token_ids, prepped):
    """token_ids: int32 [B, T]. prepped: output of prepare_params. Returns [B, O] f32."""
    B, T = token_ids.shape
    E, H, O = prepped["dims"]
    Ep = prepped["w_ih"].shape[0]
    Hp = prepped["w_hh"].shape[0]
    Op = prepped["w_fc"].shape[1]

    # Batch tile: minimum 8 sublanes; approach the MXU-native LHS height (256
    # on v6e/v7x) when B is large so the per-step recurrence matmul is dense.
    if B <= 8:
        Bt = 8
    else:
        Bt = min(256, _round_up(B, 8))
    Bp = _round_up(max(B, Bt), Bt)
    G = Bp // Bt

    # Gather straight from the lane-dense padded table into the kernel layout
    # [G, T*Bt, Ep] (time-major inside each batch tile). Only the tiny int32
    # token array is transposed; no padded activation scatter pass.
    tok = jnp.zeros((Bp, T), jnp.int32).at[:B, :].set(token_ids)
    tok_g = tok.reshape(G, Bt, T).transpose(0, 2, 1)          # [G, T, Bt] int32
    emb_g = prepped["emb"][tok_g].reshape(G, T * Bt, Ep)      # [G, T*Bt, Ep] bf16

    out_p = pl.pallas_call(
        rnn_fc_kernel,
        out_shape=jax.ShapeDtypeStruct((Bp, Op), jnp.float32),
        grid_spec=pltpu.PrefetchScalarGridSpec(
            num_scalar_prefetch=0,
            grid=(G,),
            in_specs=[
                pl.BlockSpec((1, T * Bt, Ep), lambda g: (g, 0, 0)),
                pl.BlockSpec((Ep, Hp), lambda g: (0, 0)),
                pl.BlockSpec((Hp, Hp), lambda g: (0, 0)),
                pl.BlockSpec((1, Hp), lambda g: (0, 0)),
                pl.BlockSpec((Hp, Op), lambda g: (0, 0)),
                pl.BlockSpec((1, Op), lambda g: (0, 0)),
            ],
            out_specs=pl.BlockSpec((Bt, Op), lambda g: (g, 0)),
            scratch_shapes=[pltpu.VMEM((T * Bt, Hp), jnp.float32)],
        ),
        compiler_params=pltpu.CompilerParams(
            dimension_semantics=("parallel",)),
    )(emb_g, prepped["w_ih"], prepped["w_hh"], prepped["b"],
      prepped["w_fc"], prepped["b_fc"])

    return out_p[:B, :O]


def init_params(key, vocab_size, padding_idx, emb_size, hidden_size, output_size):
    """Deterministic synthetic init mirroring the PyTorch module's shapes."""
    ks = jax.random.split(key, 7)
    emb = jax.random.normal(ks[0], (vocab_size, emb_size), jnp.float32)
    emb = emb.at[padding_idx].set(0.0)
    k = 1.0 / jnp.sqrt(hidden_size)
    w_ih = jax.random.uniform(ks[1], (emb_size, hidden_size), jnp.float32, -k, k)
    w_hh = jax.random.uniform(ks[2], (hidden_size, hidden_size), jnp.float32, -k, k)
    b_ih = jax.random.uniform(ks[3], (hidden_size,), jnp.float32, -k, k)
    b_hh = jax.random.uniform(ks[4], (hidden_size,), jnp.float32, -k, k)
    w_fc = jax.random.uniform(ks[5], (hidden_size, output_size), jnp.float32, -k, k)
    b_fc = jax.random.uniform(ks[6], (output_size,), jnp.float32, -k, k)
    return dict(emb=emb, w_ih=w_ih, w_hh=w_hh, b_ih=b_ih, b_hh=b_hh,
                w_fc=w_fc, b_fc=b_fc)


def reference_forward(token_ids, params):
    """Pure-f32 JAX reference of the same forward."""
    emb = params["emb"][token_ids]               # [B, T, E]
    B, T, _ = emb.shape
    H = params["w_hh"].shape[0]
    h = jnp.zeros((B, H), jnp.float32)
    for t in range(T):
        h = jnp.tanh(emb[:, t, :] @ params["w_ih"] + params["b_ih"]
                     + h @ params["w_hh"] + params["b_hh"])
    return h @ params["w_fc"] + params["b_fc"]


def reference_forward_bf16(token_ids, params):
    """Reference with GEMM operands rounded to bf16 exactly like the kernel
    (f32 accumulation, f32 recurrence) — tight check of the kernel math."""
    bf = lambda a: a.astype(jnp.bfloat16).astype(jnp.float32)
    emb = bf(params["emb"])[token_ids]
    w_ih, w_fc = bf(params["w_ih"]), bf(params["w_fc"])
    b = params["b_ih"] + params["b_hh"]
    B, T, _ = emb.shape
    H = params["w_hh"].shape[0]
    h = jnp.zeros((B, H), jnp.float32)
    for t in range(T):
        h = jnp.tanh(emb[:, t, :] @ w_ih + b + h @ params["w_hh"])
    return bf(h) @ w_fc + params["b_fc"]


if __name__ == "__main__":
    VOCAB, PAD, OUT = 100, 0, 4
    EMB, HID = 32, 32
    B, T = 2, 8

    key = jax.random.PRNGKey(0)
    k_params, k_tok = jax.random.split(key)
    params = init_params(k_params, VOCAB, PAD, EMB, HID, OUT)
    prepped = prepare_params(params)             # one-time weight packing

    token_ids = jax.random.randint(k_tok, (B, T), 1, VOCAB, dtype=jnp.int32)
    # emulate padding on the tail of sequence 1
    token_ids = token_ids.at[1, -2:].set(PAD)

    logits = rnn_forward(token_ids, prepped)
    logits = jax.block_until_ready(logits)
    assert logits.shape == (B, OUT)

    # Tight check against a reference that emulates the kernel's bf16 GEMMs.
    ref_bf16 = reference_forward_bf16(token_ids, params)
    assert jnp.allclose(logits, ref_bf16, atol=1e-3, rtol=1e-3)

    # Semantics check against the pure-f32 module math (bf16-GEMM tolerance).
    ref_f32 = reference_forward(token_ids, params)
    assert jnp.allclose(logits, ref_f32, atol=5e-2, rtol=5e-2)

    print("KERNEL_OK")
</pallas_src>

<mosaic_0001>
module attributes {stable_mosaic.version = 11 : i64} {
  func.func @rnn_fc_kernel(%arg0: i32, %arg1: memref<1x64x128xbf16, #tpu.memory_space<vmem>>, %arg2: memref<128x128xbf16, #tpu.memory_space<vmem>>, %arg3: memref<128x128xf32, #tpu.memory_space<vmem>>, %arg4: memref<1x128xf32, #tpu.memory_space<vmem>>, %arg5: memref<128x128xbf16, #tpu.memory_space<vmem>>, %arg6: memref<1x128xf32, #tpu.memory_space<vmem>>, %arg7: memref<8x128xf32, #tpu.memory_space<vmem>>, %arg8: memref<64x128xf32, #tpu.memory_space<vmem>>) attributes {dimension_semantics = [#tpu.dimension_semantics<parallel>], iteration_bounds = array<i64: 1>, scalar_prefetch = 0 : i64, scratch_operands = 1 : i64, tpu.core_type = #tpu.core_type<tc>, window_params = [{transform_indices = @transform_0, window_bounds = array<i64: 1, 64, 128>}, {pipeline_mode = #tpu.pipeline_mode<synchronous>, transform_indices = @transform_1, window_bounds = array<i64: 128, 128>}, {pipeline_mode = #tpu.pipeline_mode<synchronous>, transform_indices = @transform_2, window_bounds = array<i64: 128, 128>}, {pipeline_mode = #tpu.pipeline_mode<synchronous>, transform_indices = @transform_3, window_bounds = array<i64: 1, 128>}, {pipeline_mode = #tpu.pipeline_mode<synchronous>, transform_indices = @transform_4, window_bounds = array<i64: 128, 128>}, {pipeline_mode = #tpu.pipeline_mode<synchronous>, transform_indices = @transform_5, window_bounds = array<i64: 1, 128>}, {transform_indices = @transform_6, window_bounds = array<i64: 8, 128>}]} {
    %c0 = arith.constant 0 : index
    %c0_0 = arith.constant 0 : index
    %c0_1 = arith.constant 0 : index
    %0 = vector.load %arg1[%c0, %c0_0, %c0_1] : memref<1x64x128xbf16, #tpu.memory_space<vmem>>, vector<1x64x128xbf16>
    %1 = vector.shape_cast %0 : vector<1x64x128xbf16> to vector<64x128xbf16>
    %c0_2 = arith.constant 0 : index
    %c0_3 = arith.constant 0 : index
    %2 = vector.load %arg2[%c0_2, %c0_3] : memref<128x128xbf16, #tpu.memory_space<vmem>>, vector<128x128xbf16>
    %cst = arith.constant dense<0.000000e+00> : vector<64x128xf32>
    %3 = tpu.matmul %1, %2, %cst {dimension_numbers = #tpu.dot_dimension_numbers<[1], [0], [0], [1], [0, 0, 1, 1], [], []>} : vector<64x128xbf16>, vector<128x128xbf16>, vector<64x128xf32> -> vector<64x128xf32>
    %c0_4 = arith.constant 0 : index
    %c0_5 = arith.constant 0 : index
    %4 = vector.load %arg4[%c0_4, %c0_5] : memref<1x128xf32, #tpu.memory_space<vmem>>, vector<1x128xf32>
    %5 = vector.broadcast %4 : vector<1x128xf32> to vector<64x128xf32>
    %6 = arith.addf %3, %5 : vector<64x128xf32>
    %c0_6 = arith.constant 0 : index
    %c0_7 = arith.constant 0 : index
    %7 = vector.load %arg8[%c0_6, %c0_7] : memref<64x128xf32, #tpu.memory_space<vmem>>, vector<64x128xf32>
    tpu.vector_store %arg8[%c0_6, %c0_7], %6 {strides = array<i32>} : memref<64x128xf32, #tpu.memory_space<vmem>>, vector<64x128xf32>,
    %c0_8 = arith.constant 0 : index
    %c0_9 = arith.constant 0 : index
    %8 = vector.load %arg3[%c0_8, %c0_9] : memref<128x128xf32, #tpu.memory_space<vmem>>, vector<128x128xf32>
    %cst_10 = arith.constant 0.000000e+00 : f32
    %9 = vector.broadcast %cst_10 : f32 to vector<8x128xf32>
    %c0_i32 = arith.constant 0 : i32
    %c8_i32 = arith.constant 8 : i32
    %10 = arith.muli %c0_i32, %c8_i32 : i32
    %11 = tpu.assume_multiple %10, 8 : i32
    %12 = arith.index_cast %11 : i32 to index
    %c0_11 = arith.constant 0 : index
    %13 = vector.load %arg8[%12, %c0_11] : memref<64x128xf32, #tpu.memory_space<vmem>>, vector<8x128xf32>
    %cst_12 = arith.constant dense<0.000000e+00> : vector<8x128xf32>
    %14 = tpu.matmul %9, %8, %cst_12 {dimension_numbers = #tpu.dot_dimension_numbers<[1], [0], [0], [1], [0, 0, 1, 1], [], []>} : vector<8x128xf32>, vector<128x128xf32>, vector<8x128xf32> -> vector<8x128xf32>
    %15 = arith.addf %13, %14 : vector<8x128xf32>
    %16 = math.tanh %15 : vector<8x128xf32>
    %c1_i32 = arith.constant 1 : i32
    %c8_i32_13 = arith.constant 8 : i32
    %17 = arith.muli %c1_i32, %c8_i32_13 : i32
    %18 = tpu.assume_multiple %17, 8 : i32
    %19 = arith.index_cast %18 : i32 to index
    %c0_14 = arith.constant 0 : index
    %20 = vector.load %arg8[%19, %c0_14] : memref<64x128xf32, #tpu.memory_space<vmem>>, vector<8x128xf32>
    %cst_15 = arith.constant dense<0.000000e+00> : vector<8x128xf32>
    %21 = tpu.matmul %16, %8, %cst_15 {dimension_numbers = #tpu.dot_dimension_numbers<[1], [0], [0], [1], [0, 0, 1, 1], [], []>} : vector<8x128xf32>, vector<128x128xf32>, vector<8x128xf32> -> vector<8x128xf32>
    %22 = arith.addf %20, %21 : vector<8x128xf32>
    %23 = math.tanh %22 : vector<8x128xf32>
    %c2_i32 = arith.constant 2 : i32
    %c8_i32_16 = arith.constant 8 : i32
    %24 = arith.muli %c2_i32, %c8_i32_16 : i32
    %25 = tpu.assume_multiple %24, 8 : i32
    %26 = arith.index_cast %25 : i32 to index
    %c0_17 = arith.constant 0 : index
    %27 = vector.load %arg8[%26, %c0_17] : memref<64x128xf32, #tpu.memory_space<vmem>>, vector<8x128xf32>
    %cst_18 = arith.constant dense<0.000000e+00> : vector<8x128xf32>
    %28 = tpu.matmul %23, %8, %cst_18 {dimension_numbers = #tpu.dot_dimension_numbers<[1], [0], [0], [1], [0, 0, 1, 1], [], []>} : vector<8x128xf32>, vector<128x128xf32>, vector<8x128xf32> -> vector<8x128xf32>
    %29 = arith.addf %27, %28 : vector<8x128xf32>
    %30 = math.tanh %29 : vector<8x128xf32>
    %c3_i32 = arith.constant 3 : i32
    %c8_i32_19 = arith.constant 8 : i32
    %31 = arith.muli %c3_i32, %c8_i32_19 : i32
    %32 = tpu.assume_multiple %31, 8 : i32
    %33 = arith.index_cast %32 : i32 to index
    %c0_20 = arith.constant 0 : index
    %34 = vector.load %arg8[%33, %c0_20] : memref<64x128xf32, #tpu.memory_space<vmem>>, vector<8x128xf32>
    %cst_21 = arith.constant dense<0.000000e+00> : vector<8x128xf32>
    %35 = tpu.matmul %30, %8, %cst_21 {dimension_numbers = #tpu.dot_dimension_numbers<[1], [0], [0], [1], [0, 0, 1, 1], [], []>} : vector<8x128xf32>, vector<128x128xf32>, vector<8x128xf32> -> vector<8x128xf32>
    %36 = arith.addf %34, %35 : vector<8x128xf32>
    %37 = math.tanh %36 : vector<8x128xf32>
    %c4_i32 = arith.constant 4 : i32
    %c8_i32_22 = arith.constant 8 : i32
    %38 = arith.muli %c4_i32, %c8_i32_22 : i32
    %39 = tpu.assume_multiple %38, 8 : i32
    %40 = arith.index_cast %39 : i32 to index
    %c0_23 = arith.constant 0 : index
    %41 = vector.load %arg8[%40, %c0_23] : memref<64x128xf32, #tpu.memory_space<vmem>>, vector<8x128xf32>
    %cst_24 = arith.constant dense<0.000000e+00> : vector<8x128xf32>
    %42 = tpu.matmul %37, %8, %cst_24 {dimension_numbers = #tpu.dot_dimension_numbers<[1], [0], [0], [1], [0, 0, 1, 1], [], []>} : vector<8x128xf32>, vector<128x128xf32>, vector<8x128xf32> -> vector<8x128xf32>
    %43 = arith.addf %41, %42 : vector<8x128xf32>
    %44 = math.tanh %43 : vector<8x128xf32>
    %c5_i32 = arith.constant 5 : i32
    %c8_i32_25 = arith.constant 8 : i32
    %45 = arith.muli %c5_i32, %c8_i32_25 : i32
    %46 = tpu.assume_multiple %45, 8 : i32
    %47 = arith.index_cast %46 : i32 to index
    %c0_26 = arith.constant 0 : index
    %48 = vector.load %arg8[%47, %c0_26] : memref<64x128xf32, #tpu.memory_space<vmem>>, vector<8x128xf32>
    %cst_27 = arith.constant dense<0.000000e+00> : vector<8x128xf32>
    %49 = tpu.matmul %44, %8, %cst_27 {dimension_numbers = #tpu.dot_dimension_numbers<[1], [0], [0], [1], [0, 0, 1, 1], [], []>} : vector<8x128xf32>, vector<128x128xf32>, vector<8x128xf32> -> vector<8x128xf32>
    %50 = arith.addf %48, %49 : vector<8x128xf32>
    %51 = math.tanh %50 : vector<8x128xf32>
    %c6_i32 = arith.constant 6 : i32
    %c8_i32_28 = arith.constant 8 : i32
    %52 = arith.muli %c6_i32, %c8_i32_28 : i32
    %53 = tpu.assume_multiple %52, 8 : i32
    %54 = arith.index_cast %53 : i32 to index
    %c0_29 = arith.constant 0 : index
    %55 = vector.load %arg8[%54, %c0_29] : memref<64x128xf32, #tpu.memory_space<vmem>>, vector<8x128xf32>
    %cst_30 = arith.constant dense<0.000000e+00> : vector<8x128xf32>
    %56 = tpu.matmul %51, %8, %cst_30 {dimension_numbers = #tpu.dot_dimension_numbers<[1], [0], [0], [1], [0, 0, 1, 1], [], []>} : vector<8x128xf32>, vector<128x128xf32>, vector<8x128xf32> -> vector<8x128xf32>
    %57 = arith.addf %55, %56 : vector<8x128xf32>
    %58 = math.tanh %57 : vector<8x128xf32>
    %c7_i32 = arith.constant 7 : i32
    %c8_i32_31 = arith.constant 8 : i32
    %59 = arith.muli %c7_i32, %c8_i32_31 : i32
    %60 = tpu.assume_multiple %59, 8 : i32
    %61 = arith.index_cast %60 : i32 to index
    %c0_32 = arith.constant 0 : index
    %62 = vector.load %arg8[%61, %c0_32] : memref<64x128xf32, #tpu.memory_space<vmem>>, vector<8x128xf32>
    %cst_33 = arith.constant dense<0.000000e+00> : vector<8x128xf32>
    %63 = tpu.matmul %58, %8, %cst_33 {dimension_numbers = #tpu.dot_dimension_numbers<[1], [0], [0], [1], [0, 0, 1, 1], [], []>} : vector<8x128xf32>, vector<128x128xf32>, vector<8x128xf32> -> vector<8x128xf32>
    %64 = arith.addf %62, %63 : vector<8x128xf32>
    %65 = math.tanh %64 : vector<8x128xf32>
    %c8_i32_34 = arith.constant 8 : i32
    %66 = arith.truncf %65 : vector<8x128xf32> to vector<8x128xbf16>
    %c0_35 = arith.constant 0 : index
    %c0_36 = arith.constant 0 : index
    %67 = vector.load %arg5[%c0_35, %c0_36] : memref<128x128xbf16, #tpu.memory_space<vmem>>, vector<128x128xbf16>
    %cst_37 = arith.constant dense<0.000000e+00> : vector<8x128xf32>
    %68 = tpu.matmul %66, %67, %cst_37 {dimension_numbers = #tpu.dot_dimension_numbers<[1], [0], [0], [1], [0, 0, 1, 1], [], []>} : vector<8x128xbf16>, vector<128x128xbf16>, vector<8x128xf32> -> vector<8x128xf32>
    %c0_38 = arith.constant 0 : index
    %c0_39 = arith.constant 0 : index
    %69 = vector.load %arg6[%c0_38, %c0_39] : memref<1x128xf32, #tpu.memory_space<vmem>>, vector<1x128xf32>
    %70 = vector.broadcast %69 : vector<1x128xf32> to vector<8x128xf32>
    %71 = arith.addf %68, %70 : vector<8x128xf32>
    %c0_40 = arith.constant 0 : index
    %c0_41 = arith.constant 0 : index
    %72 = vector.load %arg7[%c0_40, %c0_41] : memref<8x128xf32, #tpu.memory_space<vmem>>, vector<8x128xf32>
    tpu.vector_store %arg7[%c0_40, %c0_41], %71 {strides = array<i32>} : memref<8x128xf32, #tpu.memory_space<vmem>>, vector<8x128xf32>,
    return
  }
  func.func @transform_0(%arg0: i32) -> (i32, i32, i32) {
    %c0_i32 = arith.constant 0 : i32
    %c0_i32_0 = arith.constant 0 : i32
    %c0_i32_1 = arith.constant 0 : i32
    return %arg0, %c0_i32, %c0_i32_0 : i32, i32, i32
  }
  func.func @transform_1(%arg0: i32) -> (i32, i32) {
    %c0_i32 = arith.constant 0 : i32
    %c0_i32_0 = arith.constant 0 : i32
    %c0_i32_1 = arith.constant 0 : i32
    return %c0_i32, %c0_i32_0 : i32, i32
  }
  func.func @transform_2(%arg0: i32) -> (i32, i32) {
    %c0_i32 = arith.constant 0 : i32
    %c0_i32_0 = arith.constant 0 : i32
    %c0_i32_1 = arith.constant 0 : i32
    return %c0_i32, %c0_i32_0 : i32, i32
  }
  func.func @transform_3(%arg0: i32) -> (i32, i32) {
    %c0_i32 = arith.constant 0 : i32
    %c0_i32_0 = arith.constant 0 : i32
    %c0_i32_1 = arith.constant 0 : i32
    return %c0_i32, %c0_i32_0 : i32, i32
  }
  func.func @transform_4(%arg0: i32) -> (i32, i32) {
    %c0_i32 = arith.constant 0 : i32
    %c0_i32_0 = arith.constant 0 : i32
    %c0_i32_1 = arith.constant 0 : i32
    return %c0_i32, %c0_i32_0 : i32, i32
  }
  func.func @transform_5(%arg0: i32) -> (i32, i32) {
    %c0_i32 = arith.constant 0 : i32
    %c0_i32_0 = arith.constant 0 : i32
    %c0_i32_1 = arith.constant 0 : i32
    return %c0_i32, %c0_i32_0 : i32, i32
  }
  func.func @transform_6(%arg0: i32) -> (i32, i32) {
    %c0_i32 = arith.constant 0 : i32
    %c0_i32_0 = arith.constant 0 : i32
    return %arg0, %c0_i32 : i32, i32
  }
}

</mosaic_0001>

<bundles_post_ra>
// kernel: tpu_custom_call.1
= control target key start
LH: loop header
LB: loop body
LE: loop exit
PB: predicated region body
PF: predicated region fallthrough
CT: control target
= control target key end

     0   :  { %11 = vsyncpa [#allocation4], 0  ;;  %s2179_s0 = inlined_call_operand.hbm [shape: bf16[1,64,128], index: 0, kind: input, shape index: {}]   ;;  %s2180_s1 = inlined_call_operand.hbm [shape: bf16[128,128], index: 1, kind: input, shape index: {}]   ;;  %s2181_s2 = inlined_call_operand.hbm [shape: f32[128,128], index: 2, kind: input, shape index: {}]   ;;  %s2182_s3 = inlined_call_operand.vmem [shape: f32[1,128], index: 3, kind: input, shape index: {}]   ;;  %s2183_s4 = inlined_call_operand.hbm [shape: bf16[128,128], index: 4, kind: input, shape index: {}]   ;;  %s2184_s5 = inlined_call_operand.vmem [shape: f32[1,128], index: 5, kind: input, shape index: {}]   ;;  %s2185_s6 = inlined_call_operand.hbm [shape: f32[8,128], index: 6, kind: output, shape index: {}]  }
   0x1   :  { %12 = vsyncpa [#allocation7], 0 }
   0x2   :  { %13 = vsyncpa [#allocation10], 0 }
   0x3   :  { %14 = vsyncpa [#allocation5], 0  ;;  %s1854_s21 = smov [#allocation6]   ;;  %s1855_s23 = smov [#allocation3]  }
   0x4   :  { %s32_s22 = sshll.u32 %s1854_s21, 4  ;;  %s20_s24 = sshll.u32 %s1855_s23, 4  ;;  %s33_s22 = int_to_ptr.vmem [resolvable:$true] %s32_s22  ;;  %s1901_s24 = int_to_ptr.vmem [resolvable:$true] %s20_s24 }
   0x5   :  { %s1736_s27 = scalar_lea.hbm %s2180_s1, 1024 }
   0x6   :  { %p1737_p0 = scmp.ne.s32.totalorder %s2180_s1, %s1736_s27  ;;  %p1740_p1 = scmp.lt.u32.totalorder %s1736_s27, %s2180_s1 }
   0x8   :  { %p1742_p2 = pnand %p1740_p1, %p1737_p0 }
   0xa   :  { %1745 = shalt.err (!%p1742_p2)
}
   0xb   :  { %s1746_s8 = scalar_lea.vmem %s33_s22, 1024  ;;  %p1751_p4 = scmp.lt.s32.totalorder %s33_s22, %s33_s22 }
   0xc   :  { %p1747_p3 = scmp.ne.s32.totalorder %s33_s22, %s1746_s8  ;;  %p1752_p5 = scmp.lt.s32.totalorder %s1746_s8, %s1746_s8 }
   0xe   :  { %p1753_p6 = por %p1752_p5, %p1751_p4 }
  0x10   :  { %p1754_p7 = pnand %p1753_p6, %p1747_p3 }
  0x12   :  { %1757 = shalt.err (!%p1754_p7)
}
  0x13   :  { %s1856_s9 = smov 64   ;;  %s1857_s10 = smov 4  }
  0x14   :  { %38 = dma.hbm_to_vmem [thread:$0]  %s2180_s1, 1024, %s33_s22, [#allocation7], %s1856_s9, %s1856_s9, %s1857_s10  }
  0x15   :  { %s1758_s15 = scalar_lea.hbm %s2179_s0, 512 }
  0x16   :  { %p1759_p8 = scmp.ne.s32.totalorder %s2179_s0, %s1758_s15  ;;  %p1762_p9 = scmp.lt.u32.totalorder %s1758_s15, %s2179_s0 }
  0x18   :  { %p1764_p10 = pnand %p1762_p9, %p1759_p8 }
  0x1a   :  { %1767 = shalt.err (!%p1764_p10)
}
  0x1b   :  { %s1768_s20 = scalar_lea.vmem %s1901_s24, 512  ;;  %p1773_p12 = scmp.lt.s32.totalorder %s1901_s24, %s1901_s24 }
  0x1c   :  { %p1769_p11 = scmp.ne.s32.totalorder %s1901_s24, %s1768_s20  ;;  %p1774_p13 = scmp.lt.s32.totalorder %s1768_s20, %s1768_s20 }
  0x1e   :  { %p1775_p0 = por %p1774_p13, %p1773_p12 }
  0x20   :  { %p1776_p1 = pnand %p1775_p0, %p1769_p11 }
  0x22   :  { %1779 = shalt.err (!%p1776_p1)
}
  0x23   :  { %26 = dma.hbm_to_vmem [thread:$0]  %s2179_s0, 512, %s1901_s24, [#allocation4], %s1856_s9, %s1856_s9, %s1857_s10  }
  0x24   :  { %s1858_s22 = smov [#allocation8]   ;;  %s1780_s27 = scalar_lea.hbm %s2181_s2, 2048 }
  0x25   :  { %s44_s23 = sshll.u32 %s1858_s22, 4  ;;  %p1781_p2 = scmp.ne.s32.totalorder %s2181_s2, %s1780_s27  ;;  %s45_s23 = int_to_ptr.vmem [resolvable:$true] %s44_s23 }
  0x26   :  { %p1784_p3 = scmp.lt.u32.totalorder %s1780_s27, %s2181_s2 }
  0x28   :  { %p1786_p4 = pnand %p1784_p3, %p1781_p2 }
  0x2a   :  { %1789 = shalt.err (!%p1786_p4)
}
  0x2b   :  { %s1790_s8 = scalar_lea.vmem %s45_s23, 2048  ;;  %p1795_p6 = scmp.lt.s32.totalorder %s45_s23, %s45_s23 }
  0x2c   :  { %p1791_p5 = scmp.ne.s32.totalorder %s45_s23, %s1790_s8  ;;  %p1796_p7 = scmp.lt.s32.totalorder %s1790_s8, %s1790_s8 }
  0x2e   :  { %p1797_p8 = por %p1796_p7, %p1795_p6 }
  0x30   :  { %p1798_p9 = pnand %p1797_p8, %p1791_p5 }
  0x32   :  { %1801 = shalt.err (!%p1798_p9)
}
  0x33   :  { %s1859_s0 = smov 128   ;;  %s1860_s24 = smov 8  }
  0x34   :  { %50 = dma.hbm_to_vmem [thread:$0]  %s2181_s2, 2048, %s45_s23, [#allocation7], %s1859_s0, %s1859_s0, %s1860_s24  }
  0x35   :  { %s1861_s13 = smov [#allocation9]   ;;  %s1802_s17 = scalar_lea.hbm %s2183_s4, 1024 }
  0x36   :  { %s58_s14 = sshll.u32 %s1861_s13, 4  ;;  %p1803_p10 = scmp.ne.s32.totalorder %s2183_s4, %s1802_s17  ;;  %s59_s14 = int_to_ptr.vmem [resolvable:$true] %s58_s14 }
  0x37   :  { %p1806_p11 = scmp.lt.u32.totalorder %s1802_s17, %s2183_s4 }
  0x39   :  { %p1808_p12 = pnand %p1806_p11, %p1803_p10 }
  0x3b   :  { %1811 = shalt.err (!%p1808_p12)
}
  0x3c   :  { %s1812_s21 = scalar_lea.vmem %s59_s14, 1024  ;;  %p1817_p0 = scmp.lt.s32.totalorder %s59_s14, %s59_s14 }
  0x3d   :  { %p1813_p13 = scmp.ne.s32.totalorder %s59_s14, %s1812_s21  ;;  %p1818_p1 = scmp.lt.s32.totalorder %s1812_s21, %s1812_s21 }
  0x3f   :  { %p1819_p2 = por %p1818_p1, %p1817_p0 }
  0x41   :  { %p1820_p3 = pnand %p1819_p2, %p1813_p13 }
  0x43   :  { %1823 = shalt.err (!%p1820_p3)
}
  0x44   :  { %64 = dma.hbm_to_vmem [thread:$0]  %s2183_s4, 1024, %s59_s14, [#allocation10], %s1856_s9, %s1856_s9, %s1857_s10  }
  0x45   :  { %1846 = dma.done.wait [#allocation4], 512  }
  0x46   :  { %1847 = vsyncadd [#allocation4], 4294966784 }
  0x47   :  { %1848 = dma.done.wait [#allocation7], 3072  }
  0x48   :  { %1849 = vsyncadd [#allocation7], 4294964224 }
  0x49   :  { %1850 = dma.done.wait [#allocation10], 1024  }
  0x4a   :  { %1851 = vsyncadd [#allocation10], 4294966272  ;;  %v1862_v0 = vmov 0.0|0.0   ;;  %vm1863_vm0 = vmmov 0   ;;  %v1864_v1 = vmov 0.0   ;;  %v1700_v2 = vld [vmem:[#allocation6] sm:$0xff]  }
  0x4b   :  { %1496 = vmatprep.subr.bf16.mxu1 %v1862_v0  ;;  %1228 = vmatprep.mubr.msk.f32.mxu1 %vm1863_vm0, %v1864_v1  ;;  %v256_v3 = vld [vmem:[#allocation8] sm:$0xff]  ;;  %v257_v4 = vld [vmem:[#allocation8 + $0x8] sm:$0xff]  ;;  %v258_v7 = vld [vmem:[#allocation8 + $0x10] sm:$0xff]  ;;  %s1865_s23 = smov [#allocation11]  }
  0x4c   :  { %1172 = vmatprep.subr.bf16.mxu0 %v1700_v2  ;;  %v1968_v5 = vpack.c.bf16 %v257_v4, %v256_v3  ;;  %v1701_v6 = vld [vmem:[#allocation6 + $0x8] sm:$0xff]   ;;  %v259_v8 = vld [vmem:[#allocation8 + $0x18] sm:$0xff]  ;;  %v1702_v10 = vld [vmem:[#allocation6 + $0x10] sm:$0xff]   ;;  %s982_s25 = sshll.u32 %s1865_s23, 4  ;;  %s983_s25 = int_to_ptr.vmem [resolvable:$true] %s982_s25 }
  0x4d   :  { %1173 = vmatpush3.bf16.msra.mxu0 %v1700_v2  ;;  %v1971_v9 = vpack.c.bf16 %v259_v8, %v258_v7  ;;  %v260_v11 = vld [vmem:[#allocation8 + $0x20] sm:$0xff]  ;;  %v261_v12 = vld [vmem:[#allocation8 + $0x28] sm:$0xff]  ;;  %v1703_v14 = vld [vmem:[#allocation6 + $0x18] sm:$0xff]   ;;  %s1824_s26 = scalar_lea.vmem %s983_s25, 128  ;;  %p1829_p5 = scmp.lt.s32.totalorder %s983_s25, %s983_s25 }
  0x4e   :  { %1498 = vmatpush3.bf16.msra.mxu1 %v1968_v5  ;;  %1174 = vmatprep.subr.bf16.mxu0 %v1701_v6  ;;  %v1975_v13 = vpack.c.bf16 %v261_v12, %v260_v11  ;;  %v262_v15 = vld [vmem:[#allocation8 + $0x30] sm:$0xff]  ;;  %v263_v16 = vld [vmem:[#allocation8 + $0x38] sm:$0xff]  ;;  %v1704_v17 = vld [vmem:[#allocation6 + $0x20] sm:$0xff]   ;;  %p1825_p4 = scmp.ne.s32.totalorder %s983_s25, %s1824_s26  ;;  %p1830_p6 = scmp.lt.s32.totalorder %s1824_s26, %s1824_s26 }
  0x4f   :  { %1499 = vmatprep.subr.bf16.mxu1 %v1862_v0  ;;  %v1979_v18 = vpack.c.bf16 %v263_v16, %v262_v15  ;;  %v264_v19 = vld [vmem:[#allocation8 + $0x40] sm:$0xff]  ;;  %v265_v20 = vld [vmem:[#allocation8 + $0x48] sm:$0xff]  ;;  %v266_v23 = vld [vmem:[#allocation8 + $0x50] sm:$0xff] }
  0x50   :  { %v1708_v21 = vld [vmem:[#allocation3] sm:$0xff]   ;;  %v1705_v22 = vld [vmem:[#allocation6 + $0x28] sm:$0xff]   ;;  %v267_v24 = vld [vmem:[#allocation8 + $0x58] sm:$0xff]  ;;  %v1983_v25 = vpack.c.bf16 %v265_v20, %v264_v19  ;;  %p1831_p7 = por %p1830_p6, %p1829_p5 }
  0x51   :  { %1175 = vmatpush3.bf16.msra.mxu0 %v1701_v6  ;;  %1188 = vmatprep.mubr.bf16.mxu0 %v1708_v21  ;;  %v1706_v26 = vld [vmem:[#allocation6 + $0x30] sm:$0xff]   ;;  %v268_v27 = vld [vmem:[#allocation8 + $0x60] sm:$0xff]  ;;  %v269_v28 = vld [vmem:[#allocation8 + $0x68] sm:$0xff]  ;;  %v1987_v29 = vpack.c.bf16 %v267_v24, %v266_v23 }
  0x52   :  { %1501 = vmatpush3.bf16.msra.mxu1 %v1971_v9  ;;  %1176 = vmatprep.subr.bf16.mxu0 %v1702_v10  ;;  %v1991_v30 = vpack.c.bf16 %v269_v28, %v268_v27  ;;  %v1707_v31 = vld [vmem:[#allocation6 + $0x38] sm:$0xff]   ;;  %v270_v32 = vld [vmem:[#allocation8 + $0x70] sm:$0xff]  ;;  %v1709_v35 = vld [vmem:[#allocation3 + $0x8] sm:$0xff]   ;;  %p1832_p8 = pnand %p1831_p7, %p1825_p4 }
  0x53   :  { %1502 = vmatprep.subr.bf16.mxu1 %v1862_v0  ;;  %v271_v33 = vld [vmem:[#allocation8 + $0x78] sm:$0xff]  ;;  %v1710_v36 = vld [vmem:[#allocation3 + $0x10] sm:$0xff]   ;;  %v2041_v38 = vld [vmem:[%s2182_s3] ss:$0 sm:$0xff] }
  0x54   :  { %v1995_v34 = vpack.c.bf16 %v271_v33, %v270_v32  ;;  %v1711_v37 = vld [vmem:[#allocation3 + $0x18] sm:$0xff]   ;;  %v1712_v15 = vld [vmem:[#allocation9] sm:$0xff]   ;;  %v1713_v16 = vld [vmem:[#allocation9 + $0x8] sm:$0xff]  }
  0x55   :  { %1177 = vmatpush3.bf16.msra.mxu0 %v1702_v10  ;;  %v1716_v23 = vld [vmem:[#allocation9 + $0x20] sm:$0xff]   ;;  %v1717_v24 = vld [vmem:[#allocation9 + $0x28] sm:$0xff]  }
  0x56   :  { %1504 = vmatpush3.bf16.msra.mxu1 %v1975_v13  ;;  %1178 = vmatprep.subr.bf16.mxu0 %v1703_v14  ;;  %v1006_v33 = vld [vmem:[%s2184_s5] ss:$0 sm:$0xff] }
  0x57   :  { %1505 = vmatprep.subr.bf16.mxu1 %v1862_v0 }
  0x59   :  { %1179 = vmatpush3.bf16.msra.mxu0 %v1703_v14 }
  0x5a   :  { %1507 = vmatpush3.bf16.msra.mxu1 %v1979_v18  ;;  %1180 = vmatprep.subr.bf16.mxu0 %v1704_v17 }
  0x5b   :  { %1508 = vmatprep.subr.bf16.mxu1 %v1862_v0 }
  0x5d   :  { %1181 = vmatpush3.bf16.msra.mxu0 %v1704_v17  ;;  %v1715_v17 = vld [vmem:[#allocation9 + $0x18] sm:$0xff]  }
  0x5e   :  { %1510 = vmatpush3.bf16.msra.mxu1 %v1983_v25  ;;  %1182 = vmatprep.subr.bf16.mxu0 %v1705_v22 }
  0x5f   :  { %1511 = vmatprep.subr.bf16.mxu1 %v1862_v0 }
  0x61   :  { %1183 = vmatpush3.bf16.msra.mxu0 %v1705_v22 }
  0x62   :  { %1513 = vmatpush3.bf16.msra.mxu1 %v1987_v29  ;;  %1184 = vmatprep.subr.bf16.mxu0 %v1706_v26 }
  0x63   :  { %1514 = vmatprep.subr.bf16.mxu1 %v1862_v0 }
  0x65   :  { %1185 = vmatpush3.bf16.msra.mxu0 %v1706_v26  ;;  %v1719_v26 = vld [vmem:[#allocation9 + $0x38] sm:$0xff]  }
  0x66   :  { %1516 = vmatpush3.bf16.msra.mxu1 %v1991_v30  ;;  %1186 = vmatprep.subr.bf16.mxu0 %v1707_v31 }
  0x67   :  { %1517 = vmatprep.subr.bf16.mxu1 %v1862_v0 }
  0x69   :  { %1187 = vmatpush3.bf16.msra.mxu0 %v1707_v31 }
  0x6a   :  { %1519 = vmatpush3.bf16.msra.mxu1 %v1995_v34  ;;  %1520 = vmatprep.subr.bf16.mxu0 %v1862_v0 }
  0x6b   :  { %1544 = vmatprep.subr.bf16.mxu1 %v1862_v0 }
  0x6c   :  { %1189 = vmatmul.mubr.bf16.vlgmr.msra.gmra.mrb[0].mxu0 %v1709_v35 }
  0x6d   :  { %1229 = vmatmul.mubr.f32.vlgmr.msra.gmra.mrb[0].mxu1 %v1864_v1  ;;  %1522 = vmatpush3.bf16.msra.mxu0 %v1968_v5 }
  0x6e   :  { %1523 = vmatprep.subr.bf16.mxu0 %v1862_v0  ;;  %1546 = vmatpush3.bf16.msra.mxu1 %v1968_v5 }
  0x6f   :  { %1547 = vmatprep.subr.bf16.mxu1 %v1862_v0  ;;  %1298 = vmatprep.mubr.msk.f32.mxu1 %vm1863_vm0, %v1864_v1 }
  0x70   :  { %1192 = vmatprep.mubr.bf16.mxu0 %v1710_v36 }
  0x71   :  { %1525 = vmatpush3.bf16.msra.mxu0 %v1971_v9 }
  0x72   :  { %1526 = vmatprep.subr.bf16.mxu0 %v1862_v0  ;;  %1549 = vmatpush3.bf16.msra.mxu1 %v1971_v9 }
  0x73   :  { %1550 = vmatprep.subr.bf16.mxu1 %v1862_v0 }
  0x74   :  { %1193 = vmatmul.mubr.bf16.gmra.mrb[4].mxu0 %v1711_v37 }
  0x75   :  { %1528 = vmatpush3.bf16.msra.mxu0 %v1975_v13  ;;  %1263 = vmatprep.mubr.msk.f32.mxu0 %vm1863_vm0, %v1864_v1 }
  0x76   :  { %1529 = vmatprep.subr.bf16.mxu0 %v1862_v0  ;;  %1552 = vmatpush3.bf16.msra.mxu1 %v1975_v13 }
  0x77   :  { %1553 = vmatprep.subr.bf16.mxu1 %v1862_v0 }
  0x79   :  { %1531 = vmatpush3.bf16.msra.mxu0 %v1979_v18 }
  0x7a   :  { %1532 = vmatprep.subr.bf16.mxu0 %v1862_v0  ;;  %1555 = vmatpush3.bf16.msra.mxu1 %v1979_v18 }
  0x7b   :  { %1556 = vmatprep.subr.bf16.mxu1 %v1862_v0 }
  0x7d   :  { %1534 = vmatpush3.bf16.msra.mxu0 %v1983_v25 }
  0x7e   :  { %1535 = vmatprep.subr.bf16.mxu0 %v1862_v0  ;;  %1558 = vmatpush3.bf16.msra.mxu1 %v1983_v25 }
  0x7f   :  { %1559 = vmatprep.subr.bf16.mxu1 %v1862_v0 }
  0x81   :  { %1537 = vmatpush3.bf16.msra.mxu0 %v1987_v29 }
  0x82   :  { %1538 = vmatprep.subr.bf16.mxu0 %v1862_v0  ;;  %1561 = vmatpush3.bf16.msra.mxu1 %v1987_v29 }
  0x83   :  { %1562 = vmatprep.subr.bf16.mxu1 %v1862_v0 }
  0x85   :  { %1540 = vmatpush3.bf16.msra.mxu0 %v1991_v30 }
  0x86   :  { %1541 = vmatprep.subr.bf16.mxu0 %v1862_v0  ;;  %1564 = vmatpush3.bf16.msra.mxu1 %v1991_v30 }
  0x87   :  { %1565 = vmatprep.subr.bf16.mxu1 %v1862_v0 }
  0x89   :  { %1543 = vmatpush3.bf16.msra.mxu0 %v1995_v34 }
  0x8a   :  { %1567 = vmatpush3.bf16.msra.mxu1 %v1995_v34  ;;  %1568 = vmatprep.subr.bf16.mxu0 %v1862_v0 }
  0x8b   :  { %1592 = vmatprep.subr.bf16.mxu1 %v1862_v0 }
 0x13f   :  { %v1190_v39 = vpop.f32.mrb[0].mxu0 }
 0x140   :  { %v217_v40 = vpop.f32.mrb[1].mxu0  ;;  %v339_v41 = vpop.f32.mrb[0].mxu1  ;;  %v226_v57 = vadd.f32 %v1190_v39, %v2041_v38 }
 0x141   :  { %v218_v42 = vadd.f32 %v2041_v38, %v217_v40  ;;  %v2044_v43 = vpop.f32.mrb[2].mxu0  ;;  %v1230_v44 = vpop.f32.mrb[1].mxu1 }
 0x142   :  { %v220_v45 = vpop.f32.mrb[3].mxu0  ;;  %v229_v62 = vadd.f32 %v2044_v43, %v2041_v38 }
 0x143   :  { %v343_v46 = vadd.f32 %v339_v41, %v218_v42  ;;  %v221_v52 = vadd.f32 %v2041_v38, %v220_v45 }
 0x145   :  { %1720 = vtanh.f32 %v343_v46 }
 0x147   :  { %v2064_v48 = vpop.f32.mrb[4].mxu0 }
 0x148   :  { %v2066_v49 = vpop.f32.mrb[5].mxu0 }
 0x149   :  { %v2068_v50 = vpop.f32.mrb[6].mxu0  ;;  %v234_v6 = vadd.f32 %v2041_v38, %v2066_v49 }
 0x14a   :  { %v2070_v51 = vpop.f32.mrb[7].mxu0  ;;  %v245_v27 = vadd.f32 %v2068_v50, %v2041_v38 }
 0x14f   :  { %v1721_v47 = vpop.eup %1720 }
 0x150   :  { %1264 = vmatmul.mubr.f32.vlgmr.msra.gmra.mrb[8].mxu0 %v1721_v47 }
 0x151   :  { %1570 = vmatpush3.bf16.msra.mxu0 %v1968_v5  ;;  %1333 = vmatprep.mubr.msk.f32.mxu0 %vm1863_vm0, %v1864_v1 }
 0x152   :  { %1571 = vmatprep.subr.bf16.mxu0 %v1862_v0 }
 0x155   :  { %1573 = vmatpush3.bf16.msra.mxu0 %v1971_v9 }
 0x156   :  { %1574 = vmatprep.subr.bf16.mxu0 %v1862_v0 }
 0x159   :  { %1576 = vmatpush3.bf16.msra.mxu0 %v1975_v13 }
 0x15a   :  { %1577 = vmatprep.subr.bf16.mxu0 %v1862_v0 }
 0x15d   :  { %1579 = vmatpush3.bf16.msra.mxu0 %v1979_v18 }
 0x15e   :  { %1580 = vmatprep.subr.bf16.mxu0 %v1862_v0 }
 0x161   :  { %1582 = vmatpush3.bf16.msra.mxu0 %v1983_v25 }
 0x162   :  { %1583 = vmatprep.subr.bf16.mxu0 %v1862_v0 }
 0x165   :  { %1585 = vmatpush3.bf16.msra.mxu0 %v1987_v29 }
 0x166   :  { %1586 = vmatprep.subr.bf16.mxu0 %v1862_v0 }
 0x169   :  { %1588 = vmatpush3.bf16.msra.mxu0 %v1991_v30 }
 0x16a   :  { %1589 = vmatprep.subr.bf16.mxu0 %v1862_v0 }
 0x16d   :  { %1591 = vmatpush3.bf16.msra.mxu0 %v1995_v34 }
 0x16e   :  { %1616 = vmatprep.subr.bf16.mxu0 %v1862_v0 }
 0x223   :  { %v413_v53 = vpop.f32.mrb[8].mxu0 }
 0x224   :  { %v417_v54 = vadd.f32 %v413_v53, %v221_v52  ;;  %v1265_v55 = vpop.f32.mrb[9].mxu0 }
 0x226   :  { %1722 = vtanh.f32 %v417_v54 }
 0x230   :  { %v1723_v56 = vpop.eup %1722 }
 0x231   :  { %1299 = vmatmul.mubr.f32.vlgmr.msra.gmra.mrb[2].mxu1 %v1723_v56 }
 0x232   :  { %1594 = vmatpush3.bf16.msra.mxu1 %v1968_v5  ;;  %1368 = vmatprep.mubr.msk.f32.mxu1 %vm1863_vm0, %v1864_v1 }
 0x233   :  { %1595 = vmatprep.subr.bf16.mxu1 %v1862_v0 }
 0x236   :  { %1597 = vmatpush3.bf16.msra.mxu1 %v1971_v9 }
 0x237   :  { %1598 = vmatprep.subr.bf16.mxu1 %v1862_v0 }
 0x23a   :  { %1600 = vmatpush3.bf16.msra.mxu1 %v1975_v13 }
 0x23b   :  { %1601 = vmatprep.subr.bf16.mxu1 %v1862_v0 }
 0x23e   :  { %1603 = vmatpush3.bf16.msra.mxu1 %v1979_v18 }
 0x23f   :  { %1604 = vmatprep.subr.bf16.mxu1 %v1862_v0 }
 0x242   :  { %1606 = vmatpush3.bf16.msra.mxu1 %v1983_v25 }
 0x243   :  { %1607 = vmatprep.subr.bf16.mxu1 %v1862_v0 }
 0x246   :  { %1609 = vmatpush3.bf16.msra.mxu1 %v1987_v29 }
 0x247   :  { %1610 = vmatprep.subr.bf16.mxu1 %v1862_v0 }
 0x24a   :  { %1612 = vmatpush3.bf16.msra.mxu1 %v1991_v30 }
 0x24b   :  { %1613 = vmatprep.subr.bf16.mxu1 %v1862_v0 }
 0x24e   :  { %1615 = vmatpush3.bf16.msra.mxu1 %v1995_v34 }
 0x24f   :  { %1640 = vmatprep.subr.bf16.mxu1 %v1862_v0 }
 0x304   :  { %v487_v58 = vpop.f32.mrb[2].mxu1 }
 0x305   :  { %v491_v59 = vadd.f32 %v487_v58, %v226_v57  ;;  %v1300_v60 = vpop.f32.mrb[3].mxu1 }
 0x307   :  { %1724 = vtanh.f32 %v491_v59 }
 0x311   :  { %v1725_v61 = vpop.eup %1724 }
 0x312   :  { %1334 = vmatmul.mubr.f32.vlgmr.msra.gmra.mrb[10].mxu0 %v1725_v61 }
 0x313   :  { %1618 = vmatpush3.bf16.msra.mxu0 %v1968_v5  ;;  %1403 = vmatprep.mubr.msk.f32.mxu0 %vm1863_vm0, %v1864_v1 }
 0x314   :  { %1619 = vmatprep.subr.bf16.mxu0 %v1862_v0 }
 0x317   :  { %1621 = vmatpush3.bf16.msra.mxu0 %v1971_v9 }
 0x318   :  { %1622 = vmatprep.subr.bf16.mxu0 %v1862_v0 }
 0x31b   :  { %1624 = vmatpush3.bf16.msra.mxu0 %v1975_v13 }
 0x31c   :  { %1625 = vmatprep.subr.bf16.mxu0 %v1862_v0 }
 0x31f   :  { %1627 = vmatpush3.bf16.msra.mxu0 %v1979_v18 }
 0x320   :  { %1628 = vmatprep.subr.bf16.mxu0 %v1862_v0 }
 0x323   :  { %1630 = vmatpush3.bf16.msra.mxu0 %v1983_v25 }
 0x324   :  { %1631 = vmatprep.subr.bf16.mxu0 %v1862_v0 }
 0x327   :  { %1633 = vmatpush3.bf16.msra.mxu0 %v1987_v29 }
 0x328   :  { %1634 = vmatprep.subr.bf16.mxu0 %v1862_v0 }
 0x32b   :  { %1636 = vmatpush3.bf16.msra.mxu0 %v1991_v30 }
 0x32c   :  { %1637 = vmatprep.subr.bf16.mxu0 %v1862_v0 }
 0x32f   :  { %1639 = vmatpush3.bf16.msra.mxu0 %v1995_v34 }
 0x330   :  { %1664 = vmatprep.subr.bf16.mxu0 %v1862_v0 }
 0x3e5   :  { %v561_v63 = vpop.f32.mrb[10].mxu0 }
 0x3e6   :  { %v565_v2 = vadd.f32 %v561_v63, %v229_v62  ;;  %v1335_v3 = vpop.f32.mrb[11].mxu0 }
 0x3e8   :  { %1726 = vtanh.f32 %v565_v2 }
 0x3f2   :  { %v1727_v4 = vpop.eup %1726 }
 0x3f3   :  { %1369 = vmatmul.mubr.f32.vlgmr.msra.gmra.mrb[4].mxu1 %v1727_v4 }
 0x3f4   :  { %1642 = vmatpush3.bf16.msra.mxu1 %v1968_v5  ;;  %1438 = vmatprep.mubr.msk.f32.mxu1 %vm1863_vm0, %v1864_v1 }
 0x3f5   :  { %1643 = vmatprep.subr.bf16.mxu1 %v1862_v0 }
 0x3f8   :  { %1645 = vmatpush3.bf16.msra.mxu1 %v1971_v9 }
 0x3f9   :  { %1646 = vmatprep.subr.bf16.mxu1 %v1862_v0 }
 0x3fc   :  { %1648 = vmatpush3.bf16.msra.mxu1 %v1975_v13 }
 0x3fd   :  { %1649 = vmatprep.subr.bf16.mxu1 %v1862_v0 }
 0x400   :  { %1651 = vmatpush3.bf16.msra.mxu1 %v1979_v18 }
 0x401   :  { %1652 = vmatprep.subr.bf16.mxu1 %v1862_v0 }
 0x404   :  { %1654 = vmatpush3.bf16.msra.mxu1 %v1983_v25 }
 0x405   :  { %1655 = vmatprep.subr.bf16.mxu1 %v1862_v0 }
 0x408   :  { %1657 = vmatpush3.bf16.msra.mxu1 %v1987_v29 }
 0x409   :  { %1658 = vmatprep.subr.bf16.mxu1 %v1862_v0 }
 0x40c   :  { %1660 = vmatpush3.bf16.msra.mxu1 %v1991_v30 }
 0x40d   :  { %1661 = vmatprep.subr.bf16.mxu1 %v1862_v0 }
 0x410   :  { %1663 = vmatpush3.bf16.msra.mxu1 %v1995_v34 }
 0x411   :  { %1476 = vmatprep.subr.bf16.mxu1 %v1864_v1 }
 0x4c6   :  { %v635_v7 = vpop.f32.mrb[4].mxu1 }
 0x4c7   :  { %v639_v8 = vadd.f32 %v635_v7, %v234_v6  ;;  %v1370_v10 = vpop.f32.mrb[5].mxu1 }
 0x4c9   :  { %1728 = vtanh.f32 %v639_v8 }
 0x4d3   :  { %v1729_v11 = vpop.eup %1728 }
 0x4d4   :  { %1404 = vmatmul.mubr.f32.vlgmr.msra.gmra.mrb[12].mxu0 %v1729_v11 }
 0x4d5   :  { %1666 = vmatpush3.bf16.msra.mxu0 %v1968_v5  ;;  %1473 = vmatprep.mubr.msk.f32.mxu0 %vm1863_vm0, %v1864_v1  ;;  %v237_v5 = vadd.f32 %v2041_v38, %v2070_v51 }
 0x4d6   :  { %1667 = vmatprep.subr.bf16.mxu0 %v1862_v0 }
 0x4d9   :  { %1669 = vmatpush3.bf16.msra.mxu0 %v1971_v9 }
 0x4da   :  { %1670 = vmatprep.subr.bf16.mxu0 %v1862_v0 }
 0x4dd   :  { %1672 = vmatpush3.bf16.msra.mxu0 %v1975_v13 }
 0x4de   :  { %1673 = vmatprep.subr.bf16.mxu0 %v1862_v0 }
 0x4e1   :  { %1675 = vmatpush3.bf16.msra.mxu0 %v1979_v18  ;;  %v242_v18 = vadd.f32 %v2064_v48, %v2041_v38 }
 0x4e2   :  { %1676 = vmatprep.subr.bf16.mxu0 %v1862_v0 }
 0x4e5   :  { %1678 = vmatpush3.bf16.msra.mxu0 %v1983_v25  ;;  %v1718_v25 = vld [vmem:[#allocation9 + $0x30] sm:$0xff]  }
 0x4e6   :  { %1679 = vmatprep.subr.bf16.mxu0 %v1862_v0 }
 0x4e9   :  { %1681 = vmatpush3.bf16.msra.mxu0 %v1987_v29 }
 0x4ea   :  { %1682 = vmatprep.subr.bf16.mxu0 %v1862_v0 }
 0x4ed   :  { %1684 = vmatpush3.bf16.msra.mxu0 %v1991_v30 }
 0x4ee   :  { %1685 = vmatprep.subr.bf16.mxu0 %v1862_v0  ;;  %v1714_v0 = vld [vmem:[#allocation9 + $0x10] sm:$0xff]  }
 0x4f1   :  { %1687 = vmatpush3.bf16.msra.mxu0 %v1995_v34 }
 0x5a7   :  { %v709_v9 = vpop.f32.mrb[12].mxu0 }
 0x5a8   :  { %v713_v12 = vadd.f32 %v709_v9, %v237_v5  ;;  %v1405_v13 = vpop.f32.mrb[13].mxu0 }
 0x5aa   :  { %1730 = vtanh.f32 %v713_v12 }
 0x5b4   :  { %v1731_v14 = vpop.eup %1730 }
 0x5b5   :  { %1439 = vmatmul.mubr.f32.vlgmr.msra.gmra.mrb[6].mxu1 %v1731_v14 }
 0x5b6   :  { %1492 = vmatprep.mubr.msk.bf16.mxu1 %vm1863_vm0, %v1864_v1  ;;  %1477 = vmatpush3.bf16.msra.mxu1 %v1712_v15 }
 0x5b7   :  { %1478 = vmatprep.subr.bf16.mxu1 %v1864_v1 }
 0x5ba   :  { %1479 = vmatpush3.bf16.msra.mxu1 %v1713_v16 }
 0x5bb   :  { %1480 = vmatprep.subr.bf16.mxu1 %v1864_v1 }
 0x5be   :  { %1481 = vmatpush3.bf16.msra.mxu1 %v1714_v0 }
 0x5bf   :  { %1482 = vmatprep.subr.bf16.mxu1 %v1864_v1 }
 0x5c2   :  { %1483 = vmatpush3.bf16.msra.mxu1 %v1715_v17 }
 0x5c3   :  { %1484 = vmatprep.subr.bf16.mxu1 %v1864_v1 }
 0x5c6   :  { %1485 = vmatpush3.bf16.msra.mxu1 %v1716_v23 }
 0x5c7   :  { %1486 = vmatprep.subr.bf16.mxu1 %v1864_v1 }
 0x5ca   :  { %1487 = vmatpush3.bf16.msra.mxu1 %v1717_v24 }
 0x5cb   :  { %1488 = vmatprep.subr.bf16.mxu1 %v1864_v1 }
 0x5ce   :  { %1489 = vmatpush3.bf16.msra.mxu1 %v1718_v25 }
 0x5cf   :  { %1490 = vmatprep.subr.bf16.mxu1 %v1864_v1 }
 0x5d2   :  { %1491 = vmatpush3.bf16.msra.mxu1 %v1719_v26 }
 0x688   :  { %v783_v19 = vpop.f32.mrb[6].mxu1 }
 0x689   :  { %v787_v20 = vadd.f32 %v783_v19, %v242_v18  ;;  %v1440_v21 = vpop.f32.mrb[7].mxu1 }
 0x68b   :  { %1732 = vtanh.f32 %v787_v20 }
 0x695   :  { %v1733_v22 = vpop.eup %1732 }
 0x696   :  { %1474 = vmatmul.mubr.f32.vlgmr.msra.gmra.mrb[14].mxu0 %v1733_v22 }
 0x769   :  { %v857_v28 = vpop.f32.mrb[14].mxu0 }
 0x76a   :  { %v861_v29 = vadd.f32 %v857_v28, %v245_v27  ;;  %v1475_v30 = vpop.f32.mrb[15].mxu0 }
 0x76c   :  { %1734 = vtanh.f32 %v861_v29 }
 0x776   :  { %v1735_v31 = vpop.eup %1734 }
 0x777   :  { %v863_v32 = vpack.c.bf16 %v1735_v31, %v1735_v31 }
 0x779   :  { %1493 = vmatmul.mubr.bf16.vlgmr.msra.gmra.mrb[8].mxu1 %v863_v32 }
 0x84c   :  { %v969_v34 = vpop.f32.mrb[8].mxu1 }
 0x84d   :  { %v970_v1 = vadd.f32 %v1006_v33, %v969_v34  ;;  %v1494_v35 = vpop.f32.mrb[9].mxu1 }
 0x84e   :  { %v972_v36 = vpop.f32.mrb[10].mxu1 }
 0x84f   :  { %975 = vst [vmem:[#allocation11] sm:$0xff] %v970_v1  ;;  %v1495_v37 = vpop.f32.mrb[11].mxu1 }
 0x850   :  { %1835 = shalt.err (!%p1832_p8)
}
 0x851   :  { %s1836_s5 = scalar_lea.hbm %s2185_s6, 128 }
 0x852   :  { %p1837_p9 = scmp.ne.s32.totalorder %s2185_s6, %s1836_s5  ;;  %p1840_p10 = scmp.lt.u32.totalorder %s1836_s5, %s2185_s6 }
 0x854   :  { %p1842_p11 = pnand %p1840_p10, %p1837_p9 }
 0x856   :  { %1845 = shalt.err (!%p1842_p11)
}
 0x857   :  { %985 = dma.vmem_to_hbm [thread:$0]  %s983_s25, 128, %s2185_s6, [#allocation5]  }
 0x858   :  { %1852 = dma.done.wait [#allocation5], 128  }
 0x859   :  { %1853 = vsyncadd [#allocation5], 4294967168 }
 0x85a   :  { %989 = vsyncpa [#allocation4], 1 }
 0x85b   :  { %990 = vsyncpa [#allocation7], 1 }
 0x85c   :  { %991 = vsyncpa [#allocation10], 1 }
 0x85d   :  { %992 = vsyncpa [#allocation5], 1 }

</bundles_post_ra>
